<compile_context>
chip_gen: v7x
topology: tpu7x:2x2x1
jax: 0.10.0
libtpu: 0.0.40
codegen_flags: <defaults>
</compile_context>

<pallas_src>
import functools
import math

import jax
import jax.numpy as jnp
from jax import lax
from jax.experimental import pallas as pl
from jax.experimental.pallas import tpu as pltpu


def _qkv_attention_kernel(q_ref, k_ref, v_ref, o_ref, *, scale2):
    # q_ref: (G, C, TQ)   k_ref / v_ref: (G, C, T)   o_ref: (G, C, TQ)
    q = q_ref[...] * scale2          # weak-typed scalar: stays in input dtype
    k = k_ref[...]
    v = v_ref[...]

    # w[g, t, s] = sum_c q[g, c, t] * k[g, c, s]   (MXU, f32 accumulation,
    # transpose of q fused into the contraction — no explicit q.T copy)
    w = lax.dot_general(
        q, k,
        dimension_numbers=(((1,), (1,)), ((0,), (0,))),
        preferred_element_type=jnp.float32)          # (G, TQ, T), f32

    # softmax over keys, in f32 (like the reference)
    w = w - jnp.max(w, axis=-1, keepdims=True)
    w = jnp.exp(w)
    w = w * pl.reciprocal(jnp.sum(w, axis=-1, keepdims=True), approx=True)

    # match the reference: PV matmul done in the input dtype
    p = w.astype(v.dtype)

    # a[g, c, t] = sum_s v[g, c, s] * p[g, t, s]   (no explicit w.T copy)
    a = lax.dot_general(
        v, p,
        dimension_numbers=(((2,), (2,)), ((0,), (0,))),
        preferred_element_type=jnp.float32)          # (G, C, TQ)

    o_ref[...] = a.astype(o_ref.dtype)


def qkv_attention_legacy(qkv, n_heads, *, max_q_tile=256, max_group=8):
    """Pallas equivalent of QKVAttentionLegacy.forward.

    qkv: [N, H*3*C, T]  ->  returns [N, H*C, T]
    """
    bs, width, length = qkv.shape
    assert width % (3 * n_heads) == 0
    ch = width // (3 * n_heads)
    scale2 = 1.0 / math.sqrt(ch)     # == (1/ch**0.25)**2, applied to q only

    b = bs * n_heads
    qkv_r = qkv.reshape(b, 3 * ch, length)   # glue reshape / slices in plain JAX
    q = qkv_r[:, :ch, :]
    k = qkv_r[:, ch:2 * ch, :]
    v = qkv_r[:, 2 * ch:, :]

    # Query-time tile: keeps the f32 score tile O(tq * T) instead of O(T^2).
    tq = length if length <= max_q_tile else max_q_tile

    # (batch*head) pairs per grid step: amortize per-step overhead and DMA,
    # but keep the (G, tq, T) f32 score tile under ~8 MiB of VMEM.
    score_bytes = tq * length * 4
    g_cap = max(1, (8 * 1024 * 1024) // score_bytes)
    group = 1
    for d in range(1, min(b, max_group, g_cap) + 1):
        if b % d == 0:
            group = d

    grid = (b // group, pl.cdiv(length, tq))

    kernel = functools.partial(_qkv_attention_kernel, scale2=scale2)

    itemsize = jnp.dtype(qkv.dtype).itemsize
    cost = pl.CostEstimate(
        flops=4 * b * length * length * ch,
        transcendentals=b * length * length,
        bytes_accessed=4 * b * ch * length * itemsize,
    )

    out = pl.pallas_call(
        kernel,
        out_shape=jax.ShapeDtypeStruct((b, ch, length), qkv.dtype),
        grid_spec=pltpu.PrefetchScalarGridSpec(
            num_scalar_prefetch=0,
            grid=grid,
            in_specs=[
                pl.BlockSpec((group, ch, tq), lambda i, j: (i, 0, j)),
                pl.BlockSpec((group, ch, length), lambda i, j: (i, 0, 0)),
                pl.BlockSpec((group, ch, length), lambda i, j: (i, 0, 0)),
            ],
            out_specs=pl.BlockSpec((group, ch, tq), lambda i, j: (i, 0, j)),
        ),
        compiler_params=pltpu.CompilerParams(
            dimension_semantics=("parallel", "parallel"),
            vmem_limit_bytes=32 * 1024 * 1024,
        ),
        cost_estimate=cost,
    )(q, k, v)

    return out.reshape(bs, n_heads * ch, length)


def _reference(qkv, n_heads):
    """Pure-JAX reference mirroring the PyTorch forward exactly."""
    bs, width, length = qkv.shape
    ch = width // (3 * n_heads)
    qkv_r = qkv.reshape(bs * n_heads, ch * 3, length)
    q, k, v = qkv_r[:, :ch], qkv_r[:, ch:2 * ch], qkv_r[:, 2 * ch:]
    scale = 1.0 / math.sqrt(math.sqrt(ch))
    weight = jnp.einsum('bct,bcs->bts', q * scale, k * scale)
    weight = jax.nn.softmax(weight.astype(jnp.float32), axis=-1).astype(weight.dtype)
    a = jnp.einsum('bts,bcs->bct', weight, v)
    return a.reshape(bs, -1, length)


if __name__ == "__main__":
    key = jax.random.PRNGKey(0)
    n_heads = 2
    bs = 2
    ch = 16          # per-head channels
    length = 32      # sequence length T
    width = n_heads * 3 * ch  # 96

    qkv = jax.random.normal(key, (bs, width, length), dtype=jnp.float32)

    out = qkv_attention_legacy(qkv, n_heads)
    out = jax.block_until_ready(out)

    ref = _reference(qkv, n_heads)
    assert out.shape == (bs, n_heads * ch, length)
    max_err = float(jnp.max(jnp.abs(out - ref)))
    # Loose-ish tolerance: the softmax denominator uses the EUP approximate
    # reciprocal (pl.reciprocal(..., approx=True)).
    assert jnp.allclose(out, ref, atol=1e-2, rtol=1e-2), f"max abs err {max_err}"

    print("KERNEL_OK")
</pallas_src>

<mosaic_0001>
module attributes {stable_mosaic.version = 11 : i64} {
  func.func @_qkv_attention_kernel(%arg0: i32, %arg1: i32, %arg2: memref<4x16x32xf32, #tpu.memory_space<vmem>>, %arg3: memref<4x16x32xf32, #tpu.memory_space<vmem>>, %arg4: memref<4x16x32xf32, #tpu.memory_space<vmem>>, %arg5: memref<4x16x32xf32, #tpu.memory_space<vmem>>) attributes {dimension_semantics = [#tpu.dimension_semantics<parallel>, #tpu.dimension_semantics<parallel>], iteration_bounds = array<i64: 1, 1>, scalar_prefetch = 0 : i64, scratch_operands = 0 : i64, tpu.core_type = #tpu.core_type<tc>, window_params = [{transform_indices = @transform_0, window_bounds = array<i64: 4, 16, 32>}, {transform_indices = @transform_1, window_bounds = array<i64: 4, 16, 32>}, {transform_indices = @transform_2, window_bounds = array<i64: 4, 16, 32>}, {transform_indices = @transform_3, window_bounds = array<i64: 4, 16, 32>}]} {
    %c0 = arith.constant 0 : index
    %c0_0 = arith.constant 0 : index
    %c0_1 = arith.constant 0 : index
    %0 = vector.load %arg2[%c0, %c0_0, %c0_1] : memref<4x16x32xf32, #tpu.memory_space<vmem>>, vector<4x16x32xf32>
    %cst = arith.constant 2.500000e-01 : f32
    %1 = vector.broadcast %cst : f32 to vector<4x16x32xf32>
    %2 = arith.mulf %0, %1 : vector<4x16x32xf32>
    %c0_2 = arith.constant 0 : index
    %c0_3 = arith.constant 0 : index
    %c0_4 = arith.constant 0 : index
    %3 = vector.load %arg3[%c0_2, %c0_3, %c0_4] : memref<4x16x32xf32, #tpu.memory_space<vmem>>, vector<4x16x32xf32>
    %c0_5 = arith.constant 0 : index
    %c0_6 = arith.constant 0 : index
    %c0_7 = arith.constant 0 : index
    %4 = vector.load %arg4[%c0_5, %c0_6, %c0_7] : memref<4x16x32xf32, #tpu.memory_space<vmem>>, vector<4x16x32xf32>
    %cst_8 = arith.constant dense<0.000000e+00> : vector<4x32x32xf32>
    %5 = tpu.matmul %2, %3, %cst_8 {dimension_numbers = #tpu.dot_dimension_numbers<[1], [1], [2], [2], [0, 0, 0, 2, 1, 2], [0], [0]>} : vector<4x16x32xf32>, vector<4x16x32xf32>, vector<4x32x32xf32> -> vector<4x32x32xf32>
    %cst_9 = arith.constant dense<0xFF800000> : vector<4x32xf32>
    %6 = vector.multi_reduction <maximumf>, %5, %cst_9 [2] : vector<4x32x32xf32> to vector<4x32xf32>
    %7 = vector.shape_cast %6 : vector<4x32xf32> to vector<4x32x1xf32>
    %8 = vector.broadcast %7 : vector<4x32x1xf32> to vector<4x32x32xf32>
    %9 = arith.subf %5, %8 : vector<4x32x32xf32>
    %10 = math.exp %9 : vector<4x32x32xf32>
    %cst_10 = arith.constant dense<0.000000e+00> : vector<4x32xf32>
    %11 = vector.multi_reduction <add>, %10, %cst_10 [2] : vector<4x32x32xf32> to vector<4x32xf32>
    %12 = vector.shape_cast %11 : vector<4x32xf32> to vector<4x32x1xf32>
    %13 = tpu.reciprocal %12 {approx = true} : vector<4x32x1xf32> -> vector<4x32x1xf32>
    %14 = vector.broadcast %13 : vector<4x32x1xf32> to vector<4x32x32xf32>
    %15 = arith.mulf %10, %14 : vector<4x32x32xf32>
    %cst_11 = arith.constant dense<0.000000e+00> : vector<4x16x32xf32>
    %16 = tpu.matmul %4, %15, %cst_11 {dimension_numbers = #tpu.dot_dimension_numbers<[2], [2], [1], [1], [0, 0, 0, 1, 1, 1], [0], [0]>} : vector<4x16x32xf32>, vector<4x32x32xf32>, vector<4x16x32xf32> -> vector<4x16x32xf32>
    %c0_12 = arith.constant 0 : index
    %c0_13 = arith.constant 0 : index
    %c0_14 = arith.constant 0 : index
    %17 = vector.load %arg5[%c0_12, %c0_13, %c0_14] : memref<4x16x32xf32, #tpu.memory_space<vmem>>, vector<4x16x32xf32>
    tpu.vector_store %arg5[%c0_12, %c0_13, %c0_14], %16 {strides = array<i32>} : memref<4x16x32xf32, #tpu.memory_space<vmem>>, vector<4x16x32xf32>,
    return
  }
  func.func @transform_0(%arg0: i32, %arg1: i32) -> (i32, i32, i32) {
    %c0_i32 = arith.constant 0 : i32
    %c0_i32_0 = arith.constant 0 : i32
    return %arg0, %c0_i32, %arg1 : i32, i32, i32
  }
  func.func @transform_1(%arg0: i32, %arg1: i32) -> (i32, i32, i32) {
    %c0_i32 = arith.constant 0 : i32
    %c0_i32_0 = arith.constant 0 : i32
    %c0_i32_1 = arith.constant 0 : i32
    return %arg0, %c0_i32, %c0_i32_0 : i32, i32, i32
  }
  func.func @transform_2(%arg0: i32, %arg1: i32) -> (i32, i32, i32) {
    %c0_i32 = arith.constant 0 : i32
    %c0_i32_0 = arith.constant 0 : i32
    %c0_i32_1 = arith.constant 0 : i32
    return %arg0, %c0_i32, %c0_i32_0 : i32, i32, i32
  }
  func.func @transform_3(%arg0: i32, %arg1: i32) -> (i32, i32, i32) {
    %c0_i32 = arith.constant 0 : i32
    %c0_i32_0 = arith.constant 0 : i32
    return %arg0, %c0_i32, %arg1 : i32, i32, i32
  }
}

</mosaic_0001>

<bundles_post_ra>
// kernel: tpu_custom_call.1
= control target key start
LH: loop header
LB: loop body
LE: loop exit
PB: predicated region body
PF: predicated region fallthrough
CT: control target
= control target key end

     0   :  { %8 = vsyncpa [#allocation3], 0  ;;  %s1880_s0 = inlined_call_operand.hbm [shape: f32[4,16,32], index: 0, kind: input, shape index: {}]   ;;  %s1881_s1 = inlined_call_operand.hbm [shape: f32[4,16,32], index: 1, kind: input, shape index: {}]   ;;  %s1882_s2 = inlined_call_operand.hbm [shape: f32[4,16,32], index: 2, kind: input, shape index: {}]   ;;  %s1883_s3 = inlined_call_operand.hbm [shape: f32[4,16,32], index: 3, kind: output, shape index: {}]  }
   0x1   :  { %9 = vsyncpa [#allocation6], 0 }
   0x2   :  { %10 = vsyncpa [#allocation4], 0  ;;  %s1581_s12 = smov [#allocation5]   ;;  %s1582_s14 = smov [#allocation2]  }
   0x3   :  { %s28_s13 = sshll.u32 %s1581_s12, 4  ;;  %s16_s15 = sshll.u32 %s1582_s14, 4  ;;  %s29_s13 = int_to_ptr.vmem [resolvable:$true] %s28_s13  ;;  %s1607_s15 = int_to_ptr.vmem [resolvable:$true] %s16_s15 }
   0x4   :  { %s1487_s18 = scalar_lea.hbm %s1881_s1, 1024 }
   0x5   :  { %p1488_p0 = scmp.ne.s32.totalorder %s1881_s1, %s1487_s18  ;;  %p1491_p1 = scmp.lt.u32.totalorder %s1487_s18, %s1881_s1 }
   0x7   :  { %p1493_p2 = pnand %p1491_p1, %p1488_p0 }
   0x9   :  { %1496 = shalt.err (!%p1493_p2)
}
   0xa   :  { %s1497_s23 = scalar_lea.vmem %s29_s13, 1024  ;;  %p1502_p4 = scmp.lt.s32.totalorder %s29_s13, %s29_s13 }
   0xb   :  { %p1498_p3 = scmp.ne.s32.totalorder %s29_s13, %s1497_s23  ;;  %p1503_p5 = scmp.lt.s32.totalorder %s1497_s23, %s1497_s23 }
   0xd   :  { %p1504_p6 = por %p1503_p5, %p1502_p4 }
   0xf   :  { %p1505_p7 = pnand %p1504_p6, %p1498_p3 }
  0x11   :  { %1508 = shalt.err (!%p1505_p7)
}
  0x12   :  { %s1583_s24 = smov 128   ;;  %s1584_s25 = smov 8  }
  0x13   :  { %34 = dma.hbm_to_vmem [thread:$0]  %s1881_s1, 1024, %s29_s13, [#allocation6], %s1583_s24, %s1583_s24, %s1584_s25  }
  0x14   :  { %s1509_s30 = scalar_lea.hbm %s1880_s0, 1024 }
  0x15   :  { %p1510_p8 = scmp.ne.s32.totalorder %s1880_s0, %s1509_s30  ;;  %p1513_p9 = scmp.lt.u32.totalorder %s1509_s30, %s1880_s0 }
  0x17   :  { %p1515_p10 = pnand %p1513_p9, %p1510_p8 }
  0x19   :  { %1518 = shalt.err (!%p1515_p10)
}
  0x1a   :  { %s1519_s8 = scalar_lea.vmem %s1607_s15, 1024  ;;  %p1524_p12 = scmp.lt.s32.totalorder %s1607_s15, %s1607_s15 }
  0x1b   :  { %p1520_p11 = scmp.ne.s32.totalorder %s1607_s15, %s1519_s8  ;;  %p1525_p13 = scmp.lt.s32.totalorder %s1519_s8, %s1519_s8 }
  0x1d   :  { %p1526_p0 = por %p1525_p13, %p1524_p12 }
  0x1f   :  { %p1527_p1 = pnand %p1526_p0, %p1520_p11 }
  0x21   :  { %1530 = shalt.err (!%p1527_p1)
}
  0x22   :  { %22 = dma.hbm_to_vmem [thread:$0]  %s1880_s0, 1024, %s1607_s15, [#allocation3], %s1583_s24, %s1583_s24, %s1584_s25  }
  0x23   :  { %s1585_s10 = smov [#allocation7]   ;;  %s1531_s14 = scalar_lea.hbm %s1882_s2, 1024 }
  0x24   :  { %s40_s11 = sshll.u32 %s1585_s10, 4  ;;  %p1532_p2 = scmp.ne.s32.totalorder %s1882_s2, %s1531_s14  ;;  %s41_s11 = int_to_ptr.vmem [resolvable:$true] %s40_s11 }
  0x25   :  { %p1535_p3 = scmp.lt.u32.totalorder %s1531_s14, %s1882_s2 }
  0x27   :  { %p1537_p4 = pnand %p1535_p3, %p1532_p2 }
  0x29   :  { %1540 = shalt.err (!%p1537_p4)
}
  0x2a   :  { %s1541_s20 = scalar_lea.vmem %s41_s11, 1024  ;;  %p1546_p6 = scmp.lt.s32.totalorder %s41_s11, %s41_s11 }
  0x2b   :  { %p1542_p5 = scmp.ne.s32.totalorder %s41_s11, %s1541_s20  ;;  %p1547_p7 = scmp.lt.s32.totalorder %s1541_s20, %s1541_s20 }
  0x2d   :  { %p1548_p8 = por %p1547_p7, %p1546_p6 }
  0x2f   :  { %p1549_p9 = pnand %p1548_p8, %p1542_p5 }
  0x31   :  { %1552 = shalt.err (!%p1549_p9)
}
  0x32   :  { %46 = dma.hbm_to_vmem [thread:$0]  %s1882_s2, 1024, %s41_s11, [#allocation6], %s1583_s24, %s1583_s24, %s1584_s25  }
  0x33   :  { %1575 = dma.done.wait [#allocation3], 1024  }
  0x34   :  { %1576 = vsyncadd [#allocation3], 4294966272 }
  0x35   :  { %1577 = dma.done.wait [#allocation6], 2048  }
  0x36   :  { %1578 = vsyncadd [#allocation6], 4294965248  ;;  %v56_v0 = vld [vmem:[#allocation2] sm:$0xff]  ;;  %v58_v1 = vld [vmem:[#allocation2 + $0x10] sm:$0xff]  ;;  %vm120_vm0 = vcmask 130048   ;;  %vm605_vm1 = vcmask 261120  }
  0x37   :  { %v57_v2 = vld [vmem:[#allocation2 + $0x8] sm:$0xff]  ;;  %v64_v3 = vmul.f32 0.25, %v56_v0  ;;  %v66_v4 = vmul.f32 0.25, %v58_v1  ;;  %v59_v5 = vld [vmem:[#allocation2 + $0x18] sm:$0xff]  ;;  %v72_v6 = vld [vmem:[#allocation5] sm:$0xff]  ;;  %s1586_s2 = smov [#allocation8]  }
  0x38   :  { %v65_v7 = vmul.f32 0.25, %v57_v2  ;;  %v67_v8 = vmul.f32 0.25, %v59_v5  ;;  %v73_v9 = vld [vmem:[#allocation5 + $0x8] sm:$0xff]  ;;  %v74_v11 = vld [vmem:[#allocation5 + $0x10] sm:$0xff]  ;;  %v75_v12 = vld [vmem:[#allocation5 + $0x18] sm:$0xff]  ;;  %s1167_s21 = sshll.u32 %s1586_s2, 4  ;;  %s1168_s21 = int_to_ptr.vmem [resolvable:$true] %s1167_s21 }
  0x39   :  { %88 = vxpose.xlu0.b32.start [1/2] (short) (narrow) %v64_v3, 32  ;;  %218 = vxpose.xlu1.b32.start [1/2] (short) (narrow) %v66_v4, 32  ;;  %v1352_v10 = vpack.c.bf16 %v73_v9, %v72_v6  ;;  %v1356_v13 = vpack.c.bf16 %v75_v12, %v74_v11  ;;  %v60_v14 = vld [vmem:[#allocation2 + $0x20] sm:$0xff]  ;;  %v62_v15 = vld [vmem:[#allocation2 + $0x30] sm:$0xff]  ;;  %v61_v18 = vld [vmem:[#allocation2 + $0x28] sm:$0xff]  ;;  %s1553_s22 = scalar_lea.vmem %s1168_s21, 1024  ;;  %p1558_p11 = scmp.lt.s32.totalorder %s1168_s21, %s1168_s21 }
  0x3a   :  { %v68_v16 = vmul.f32 0.25, %v60_v14  ;;  %v70_v17 = vmul.f32 0.25, %v62_v15  ;;  %v63_v19 = vld [vmem:[#allocation2 + $0x38] sm:$0xff]  ;;  %v69_v20 = vmul.f32 0.25, %v61_v18  ;;  %v76_v22 = vld [vmem:[#allocation5 + $0x20] sm:$0xff]  ;;  %v77_v23 = vld [vmem:[#allocation5 + $0x28] sm:$0xff]  ;;  %p1554_p10 = scmp.ne.s32.totalorder %s1168_s21, %s1553_s22  ;;  %p1559_p12 = scmp.lt.s32.totalorder %s1553_s22, %s1553_s22 }
  0x3b   :  { %1353 = vmatprep.subr.bf16.mxu0 %v1352_v10  ;;  %1357 = vmatprep.subr.bf16.mxu1 %v1356_v13  ;;  %v71_v21 = vmul.f32 0.25, %v63_v19  ;;  %v1360_v24 = vpack.c.bf16 %v77_v23, %v76_v22  ;;  %v78_v25 = vld [vmem:[#allocation5 + $0x30] sm:$0xff]  ;;  %v79_v26 = vld [vmem:[#allocation5 + $0x38] sm:$0xff]  ;;  %vm1801_vm2 = vmpackc.low %vm605_vm1, %vm605_vm1 }
  0x3c   :  { %1355 = vmatpush3.bf16.msra.mxu0 %v1352_v10  ;;  %1359 = vmatpush3.bf16.msra.mxu1 %v1356_v13  ;;  %v1364_v27 = vpack.c.bf16 %v79_v26, %v78_v25  ;;  %p1560_p13 = por %p1559_p12, %p1558_p11 }
  0x3d   :  { %89 = vxpose.xlu0.b32.end [2/2] (short) (narrow) %v65_v7, 32  ;;  %219 = vxpose.xlu1.b32.end [2/2] (short) (narrow) %v67_v8, 32 }
  0x3e   :  { %1361 = vmatprep.subr.bf16.mxu0 %v1360_v24  ;;  %1365 = vmatprep.subr.bf16.mxu1 %v1364_v27  ;;  %p1561_p0 = pnand %p1560_p13, %p1554_p10 }
  0x46   :  { %347 = vxpose.xlu0.b32.start [1/2] (short) (narrow) %v68_v16, 32  ;;  %476 = vxpose.xlu1.b32.start [1/2] (short) (narrow) %v70_v17, 32 }
  0x4a   :  { %348 = vxpose.xlu0.b32.end [2/2] (short) (narrow) %v69_v20, 32  ;;  %477 = vxpose.xlu1.b32.end [2/2] (short) (narrow) %v71_v21, 32 }
  0xb9   :  { %v104_v28 = vpop.trf.xlu0  ;;  %v234_v29 = vpop.trf.xlu1 }
  0xba   :  { %1272 = vmatprep.mubr.msk.f32.mxu0 %vm120_vm0, %v104_v28  ;;  %1282 = vmatprep.mubr.msk.f32.mxu1 %vm120_vm0, %v234_v29 }
  0xbd   :  { %v105_v30 = vpop.trf.xlu0  ;;  %v235_v31 = vpop.trf.xlu1 }
  0xbe   :  { %1273 = vmatmul.mubr.msk.f32.vlgmr.msra.gmra.mrb[0].mxu0 %vm120_vm0, %v105_v30  ;;  %1283 = vmatmul.mubr.msk.f32.vlgmr.msra.gmra.mrb[0].mxu1 %vm120_vm0, %v235_v31 }
  0xbf   :  { %1363 = vmatpush3.bf16.msra.mxu0 %v1360_v24  ;;  %1367 = vmatpush3.bf16.msra.mxu1 %v1364_v27 }
  0xc1   :  { %v106_v32 = vpop.trf.xlu0  ;;  %v236_v33 = vpop.trf.xlu1 }
  0xc2   :  { %1275 = vmatprep.mubr.msk.f32.mxu0 %vm120_vm0, %v106_v32  ;;  %1285 = vmatprep.mubr.msk.f32.mxu1 %vm120_vm0, %v236_v33 }
  0xc5   :  { %v107_v34 = vpop.trf.xlu0  ;;  %v237_v35 = vpop.trf.xlu1 }
  0xc6   :  { %1276 = vmatmul.mubr.msk.f32.gmra.mrb[2].mxu0 %vm120_vm0, %v107_v34  ;;  %1286 = vmatmul.mubr.msk.f32.gmra.mrb[2].mxu1 %vm120_vm0, %v237_v35 }
  0xc9   :  { %v363_v36 = vpop.trf.xlu0  ;;  %v492_v37 = vpop.trf.xlu1 }
  0xca   :  { %1292 = vmatprep.mubr.msk.f32.mxu0 %vm120_vm0, %v363_v36  ;;  %1302 = vmatprep.mubr.msk.f32.mxu1 %vm120_vm0, %v492_v37 }
  0xcd   :  { %v364_v38 = vpop.trf.xlu0  ;;  %v493_v39 = vpop.trf.xlu1 }
  0xce   :  { %1293 = vmatmul.mubr.msk.f32.vlgmr.msra.gmra.mrb[4].mxu0 %vm120_vm0, %v364_v38  ;;  %1303 = vmatmul.mubr.msk.f32.vlgmr.msra.gmra.mrb[4].mxu1 %vm120_vm0, %v493_v39 }
  0xd1   :  { %v365_v40 = vpop.trf.xlu0  ;;  %v494_v41 = vpop.trf.xlu1 }
  0xd2   :  { %1295 = vmatprep.mubr.msk.f32.mxu0 %vm120_vm0, %v365_v40  ;;  %1305 = vmatprep.mubr.msk.f32.mxu1 %vm120_vm0, %v494_v41 }
  0xd5   :  { %v366_v42 = vpop.trf.xlu0  ;;  %v495_v43 = vpop.trf.xlu1 }
  0xd6   :  { %1296 = vmatmul.mubr.msk.f32.gmra.mrb[6].mxu0 %vm120_vm0, %v366_v42  ;;  %1306 = vmatmul.mubr.msk.f32.gmra.mrb[6].mxu1 %vm120_vm0, %v495_v43 }
 0x191   :  { %v1274_v44 = vpop.f32.mrb[0].mxu0  ;;  %v1284_v45 = vpop.f32.mrb[0].mxu1 }
 0x192   :  { %v199_v46 = vpop.f32.mrb[1].mxu0  ;;  %v609_v47 = vsel %vm605_vm1, %v1274_v44, -inf  ;;  %v328_v48 = vpop.f32.mrb[1].mxu1  ;;  %v621_v50 = vsel %vm605_vm1, %v1284_v45, -inf }
 0x193   :  { %610 = vmax.xlane.f32.xlu1 %v609_v47  ;;  %v606_v49 = vsel %vm605_vm1, %v199_v46, -inf  ;;  %v618_v54 = vsel %vm605_vm1, %v328_v48, -inf }
 0x194   :  { %607 = vmax.xlane.f32.xlu0 %v606_v49 }
 0x197   :  { %622 = vmax.xlane.f32.xlu1 %v621_v50 }
 0x199   :  { %v1678_v51 = vpop.f32.mrb[2].mxu0  ;;  %v1680_v52 = vpop.f32.mrb[2].mxu1 }
 0x19a   :  { %v209_v53 = vpop.f32.mrb[3].mxu0  ;;  %v338_v55 = vpop.f32.mrb[3].mxu1  ;;  %v615_v57 = vsel %vm605_vm1, %v1678_v51, -inf  ;;  %v627_v59 = vsel %vm605_vm1, %v1680_v52, -inf }
 0x19b   :  { %619 = vmax.xlane.f32.xlu1 %v618_v54  ;;  %v612_v56 = vsel %vm605_vm1, %v209_v53, -inf  ;;  %v624_v58 = vsel %vm605_vm1, %v338_v55, -inf }
 0x19c   :  { %613 = vmax.xlane.f32.xlu0 %v612_v56 }
 0x19f   :  { %616 = vmax.xlane.f32.xlu1 %v615_v57 }
 0x1a0   :  { %625 = vmax.xlane.f32.xlu0 %v624_v58 }
 0x1a1   :  { %v1689_v60 = vpop.f32.mrb[4].mxu0  ;;  %v1691_v61 = vpop.f32.mrb[4].mxu1 }
 0x1a2   :  { %v1693_v62 = vpop.f32.mrb[5].mxu0  ;;  %v1695_v63 = vpop.f32.mrb[5].mxu1  ;;  %v633_v1 = vsel %vm605_vm1, %v1689_v60, -inf  ;;  %v645_v3 = vsel %vm605_vm1, %v1691_v61, -inf }
 0x1a3   :  { %628 = vmax.xlane.f32.xlu1 %v627_v59  ;;  %v630_v0 = vsel %vm605_vm1, %v1693_v62, -inf  ;;  %v642_v2 = vsel %vm605_vm1, %v1695_v63, -inf }
 0x1a4   :  { %631 = vmax.xlane.f32.xlu0 %v630_v0 }
 0x1a7   :  { %634 = vmax.xlane.f32.xlu1 %v633_v1 }
 0x1a8   :  { %643 = vmax.xlane.f32.xlu0 %v642_v2 }
 0x1a9   :  { %v1705_v4 = vpop.f32.mrb[6].mxu0  ;;  %v1707_v5 = vpop.f32.mrb[6].mxu1 }
 0x1aa   :  { %v1709_v6 = vpop.f32.mrb[7].mxu0  ;;  %v1711_v7 = vpop.f32.mrb[7].mxu1  ;;  %v639_v9 = vsel %vm605_vm1, %v1705_v4, -inf  ;;  %v651_v11 = vsel %vm605_vm1, %v1707_v5, -inf }
 0x1ab   :  { %646 = vmax.xlane.f32.xlu1 %v645_v3  ;;  %v636_v8 = vsel %vm605_vm1, %v1709_v6, -inf  ;;  %v648_v10 = vsel %vm605_vm1, %v1711_v7, -inf }
 0x1ac   :  { %637 = vmax.xlane.f32.xlu0 %v636_v8 }
 0x1af   :  { %640 = vmax.xlane.f32.xlu1 %v639_v9 }
 0x1b0   :  { %649 = vmax.xlane.f32.xlu0 %v648_v10 }
 0x1b3   :  { %652 = vmax.xlane.f32.xlu1 %v651_v11 }
 0x220   :  { %v611_v12 = vpop.xlane.xlu1 %610 }
 0x221   :  { %v655_v13 = vsub.f32 %v1274_v44, %v611_v12  ;;  %v608_v14 = vpop.xlane.xlu0 %607 }
 0x222   :  { %v654_v15 = vsub.f32 %v199_v46, %v608_v14 }
 0x223   :  { %v672_v16 = vmul.f32 1.442695, %v655_v13 }
 0x224   :  { %v670_v17 = vmul.f32 1.442695, %v654_v15  ;;  %v623_v18 = vpop.xlane.xlu1 %622 }
 0x225   :  { %1423 = vpow2.f32 %v672_v16  ;;  %v659_v19 = vsub.f32 %v1284_v45, %v623_v18 }
 0x226   :  { %1425 = vpow2.f32 %v670_v17 }
 0x227   :  { %v680_v20 = vmul.f32 1.442695, %v659_v19 }
 0x228   :  { %v620_v21 = vpop.xlane.xlu1 %619 }
 0x229   :  { %1427 = vpow2.f32 %v680_v20  ;;  %v658_v22 = vsub.f32 %v328_v48, %v620_v21  ;;  %v614_v23 = vpop.xlane.xlu0 %613 }
 0x22a   :  { %v656_v24 = vsub.f32 %v209_v53, %v614_v23 }
 0x22b   :  { %v678_v25 = vmul.f32 1.442695, %v658_v22 }
 0x22c   :  { %v674_v26 = vmul.f32 1.442695, %v656_v24  ;;  %v617_v27 = vpop.xlane.xlu1 %616 }
 0x22d   :  { %1429 = vpow2.f32 %v678_v25  ;;  %v657_v28 = vsub.f32 %v1678_v51, %v617_v27  ;;  %v626_v29 = vpop.xlane.xlu0 %625 }
 0x22e   :  { %v660_v30 = vsub.f32 %v338_v55, %v626_v29  ;;  %1431 = vpow2.f32 %v674_v26  ;;  %v82_v29 = vld [vmem:[#allocation7 + $0x10] sm:$0xff] }
 0x22f   :  { %v1722_v31 = vpop.eup %1423  ;;  %v676_v32 = vmul.f32 1.442695, %v657_v28  ;;  %v80_v28 = vld [vmem:[#allocation7] sm:$0xff]  ;;  %1327 = vmatprep.mubr.msk.f32.mxu1 %vm605_vm1, %v82_v29 }
 0x230   :  { %v1724_v33 = vpop.eup %1425  ;;  %v682_v34 = vmul.f32 1.442695, %v660_v30  ;;  %v629_v35 = vpop.xlane.xlu1 %628  ;;  %v705_v36 = vsel %vm605_vm1, %v1722_v31, 0.0  ;;  %1316 = vmatprep.mubr.msk.f32.mxu0 %vm605_vm1, %v80_v28 }
 0x231   :  { %1433 = vpow2.f32 %v676_v32  ;;  %v661_v37 = vsub.f32 %v1680_v52, %v629_v35  ;;  %706 = vadd.xlane.f32.xlu1 %v705_v36  ;;  %v632_v38 = vpop.xlane.xlu0 %631  ;;  %v702_v39 = vsel %vm605_vm1, %v1724_v33, 0.0 }
 0x232   :  { %v662_v40 = vsub.f32 %v1693_v62, %v632_v38  ;;  %703 = vadd.xlane.f32.xlu0 %v702_v39  ;;  %1435 = vpow2.f32 %v682_v34 }
 0x233   :  { %v1732_v41 = vpop.eup %1427  ;;  %v684_v42 = vmul.f32 1.442695, %v661_v37 }
 0x234   :  { %v686_v43 = vmul.f32 1.442695, %v662_v40  ;;  %v635_v44 = vpop.xlane.xlu1 %634  ;;  %v717_v45 = vsel %vm605_vm1, %v1732_v41, 0.0 }
 0x235   :  { %1437 = vpow2.f32 %v684_v42  ;;  %v663_v46 = vsub.f32 %v1689_v60, %v635_v44  ;;  %718 = vadd.xlane.f32.xlu1 %v717_v45  ;;  %v644_v47 = vpop.xlane.xlu0 %643 }
 0x236   :  { %v666_v48 = vsub.f32 %v1695_v63, %v644_v47  ;;  %1439 = vpow2.f32 %v686_v43 }
 0x237   :  { %v1738_v49 = vpop.eup %1429  ;;  %v688_v50 = vmul.f32 1.442695, %v663_v46 }
 0x238   :  { %v694_v51 = vmul.f32 1.442695, %v666_v48  ;;  %v647_v52 = vpop.xlane.xlu1 %646  ;;  %v714_v53 = vsel %vm605_vm1, %v1738_v49, 0.0  ;;  %v1742_v54 = vpop.eup %1431 }
 0x239   :  { %1441 = vpow2.f32 %v688_v50  ;;  %v667_v55 = vsub.f32 %v1691_v61, %v647_v52  ;;  %715 = vadd.xlane.f32.xlu0 %v714_v53  ;;  %v638_v56 = vpop.xlane.xlu0 %637  ;;  %v708_v0 = vsel %vm605_vm1, %v1742_v54, 0.0 }
 0x23a   :  { %v664_v57 = vsub.f32 %v1709_v6, %v638_v56  ;;  %1443 = vpow2.f32 %v694_v51 }
 0x23b   :  { %v1746_v58 = vpop.eup %1433  ;;  %v696_v59 = vmul.f32 1.442695, %v667_v55 }
 0x23c   :  { %v690_v60 = vmul.f32 1.442695, %v664_v57  ;;  %v641_v62 = vpop.xlane.xlu1 %640  ;;  %v711_v63 = vsel %vm605_vm1, %v1746_v58, 0.0  ;;  %v1752_v1 = vpop.eup %1435 }
 0x23d   :  { %1445 = vpow2.f32 %v696_v59  ;;  %v665_v61 = vsub.f32 %v1705_v4, %v641_v62  ;;  %712 = vadd.xlane.f32.xlu1 %v711_v63  ;;  %709 = vadd.xlane.f32.xlu0 %v708_v0  ;;  %v650_v2 = vpop.xlane.xlu0 %649  ;;  %v720_v12 = vsel %vm605_vm1, %v1752_v1, 0.0 }
 0x23e   :  { %v668_v3 = vsub.f32 %v1711_v7, %v650_v2  ;;  %1447 = vpow2.f32 %v690_v60 }
 0x23f   :  { %v1756_v6 = vpop.eup %1437  ;;  %v692_v8 = vmul.f32 1.442695, %v665_v61 }
 0x240   :  { %v698_v9 = vmul.f32 1.442695, %v668_v3  ;;  %v653_v10 = vpop.xlane.xlu1 %652  ;;  %v723_v11 = vsel %vm605_vm1, %v1756_v6, 0.0  ;;  %v1762_v13 = vpop.eup %1439 }
 0x241   :  { %1449 = vpow2.f32 %v692_v8  ;;  %v669_v4 = vsub.f32 %v1707_v5, %v653_v10  ;;  %724 = vadd.xlane.f32.xlu1 %v723_v11  ;;  %721 = vadd.xlane.f32.xlu0 %v720_v12  ;;  %v726_v16 = vsel %vm605_vm1, %v1762_v13, 0.0 }
 0x242   :  { %1451 = vpow2.f32 %v698_v9 }
 0x243   :  { %v1765_v7 = vpop.eup %1441  ;;  %v700_v14 = vmul.f32 1.442695, %v669_v4  ;;  %v84_v4 = vld [vmem:[#allocation7 + $0x20] sm:$0xff] }
 0x244   :  { %v729_v15 = vsel %vm605_vm1, %v1765_v7, 0.0  ;;  %v1771_v17 = vpop.eup %1443 }
 0x245   :  { %1453 = vpow2.f32 %v700_v14  ;;  %730 = vadd.xlane.f32.xlu1 %v729_v15  ;;  %727 = vadd.xlane.f32.xlu0 %v726_v16  ;;  %v738_v19 = vsel %vm605_vm1, %v1771_v17, 0.0 }
 0x247   :  { %v1773_v18 = vpop.eup %1445 }
 0x248   :  { %v741_v5 = vsel %vm605_vm1, %v1773_v18, 0.0  ;;  %v1779_v20 = vpop.eup %1447 }
 0x249   :  { %742 = vadd.xlane.f32.xlu1 %v741_v5  ;;  %739 = vadd.xlane.f32.xlu0 %v738_v19  ;;  %v732_v23 = vsel %vm605_vm1, %v1779_v20, 0.0  ;;  %v86_v19 = vld [vmem:[#allocation7 + $0x30] sm:$0xff] }
 0x24b   :  { %v1781_v21 = vpop.eup %1449 }
 0x24c   :  { %v735_v22 = vsel %vm605_vm1, %v1781_v21, 0.0  ;;  %v1787_v24 = vpop.eup %1451 }
 0x24d   :  { %736 = vadd.xlane.f32.xlu1 %v735_v22  ;;  %733 = vadd.xlane.f32.xlu0 %v732_v23  ;;  %v744_v27 = vsel %vm605_vm1, %v1787_v24, 0.0 }
 0x24f   :  { %v1789_v25 = vpop.eup %1453 }
 0x250   :  { %v747_v26 = vsel %vm605_vm1, %v1789_v25, 0.0 }
 0x251   :  { %748 = vadd.xlane.f32.xlu1 %v747_v26  ;;  %745 = vadd.xlane.f32.xlu0 %v744_v27 }
 0x2be   :  { %v707_v30 = vpop.xlane.xlu1 %706 }
 0x2bf   :  { %1455 = vrcp.f32 %v707_v30  ;;  %v704_v32 = vpop.xlane.xlu0 %703  ;;  %v87_v30 = vld [vmem:[#allocation7 + $0x38] sm:$0xff] }
 0x2c0   :  { %1457 = vrcp.f32 %v704_v32 }
 0x2c2   :  { %v719_v34 = vpop.xlane.xlu1 %718 }
 0x2c3   :  { %1459 = vrcp.f32 %v719_v34 }
 0x2c6   :  { %v716_v35 = vpop.xlane.xlu0 %715 }
 0x2c7   :  { %1461 = vrcp.f32 %v716_v35 }
 0x2c9   :  { %v1456_v36 = vpop.eup %1455 }
 0x2ca   :  { %v1458_v37 = vpop.eup %1457  ;;  %v713_v38 = vpop.xlane.xlu1 %712  ;;  %v767_v40 = vmul.f32 %v1456_v36, %v1722_v31 }
 0x2cb   :  { %v710_v39 = vpop.xlane.xlu0 %709  ;;  %1463 = vrcp.f32 %v713_v38  ;;  %v766_v42 = vmul.f32 %v1458_v37, %v1724_v33 }
 0x2cc   :  { %1465 = vrcp.f32 %v710_v39 }
 0x2cd   :  { %v1368_v44 = vpack.c.bf16 %v767_v40, %v766_v42  ;;  %v1460_v47 = vpop.eup %1459 }
 0x2ce   :  { %v725_v45 = vpop.xlane.xlu1 %724  ;;  %v771_v51 = vmul.f32 %v1460_v47, %v1732_v41 }
 0x2cf   :  { %v722_v46 = vpop.xlane.xlu0 %721  ;;  %1467 = vrcp.f32 %v725_v45  ;;  %1370 = vmatprep.subr.msk.bf16.mxu0 %vm1801_vm2, %v1368_v44 }
 0x2d0   :  { %1469 = vrcp.f32 %v722_v46  ;;  %1373 = vmatpush3.bf16.xpose.msk.msra.mxu0 %vm1801_vm2, %v1368_v44 }
 0x2d1   :  { %v1462_v31 = vpop.eup %1461 }
 0x2d2   :  { %v731_v33 = vpop.xlane.xlu1 %730  ;;  %v770_v50 = vmul.f32 %v1462_v31, %v1738_v49 }
 0x2d3   :  { %v728_v48 = vpop.xlane.xlu0 %727  ;;  %1471 = vrcp.f32 %v731_v33 }
 0x2d4   :  { %1473 = vrcp.f32 %v728_v48  ;;  %v1380_v52 = vpack.c.bf16 %v771_v51, %v770_v50 }
 0x2d5   :  { %v1464_v53 = vpop.eup %1463 }
 0x2d6   :  { %v1466_v55 = vpop.eup %1465  ;;  %v743_v56 = vpop.xlane.xlu1 %742  ;;  %1382 = vmatprep.subr.msk.bf16.mxu1 %vm1801_vm2, %v1380_v52  ;;  %v769_v59 = vmul.f32 %v1464_v53, %v1746_v58 }
 0x2d7   :  { %v740_v57 = vpop.xlane.xlu0 %739  ;;  %1475 = vrcp.f32 %v743_v56  ;;  %1385 = vmatpush3.bf16.xpose.msk.msra.mxu1 %vm1801_vm2, %v1380_v52  ;;  %v768_v49 = vmul.f32 %v1466_v55, %v1742_v54 }
 0x2d8   :  { %1477 = vrcp.f32 %v740_v57 }
 0x2d9   :  { %v1468_v41 = vpop.eup %1467  ;;  %v1374_v60 = vpack.c.bf16 %v769_v59, %v768_v49 }
 0x2da   :  { %v1470_v62 = vpop.eup %1469  ;;  %v737_v63 = vpop.xlane.xlu1 %736  ;;  %v773_v61 = vmul.f32 %v1468_v41, %v1756_v6 }
 0x2db   :  { %v734_v0 = vpop.xlane.xlu0 %733  ;;  %1479 = vrcp.f32 %v737_v63  ;;  %1376 = vmatprep.subr.msk.bf16.mxu0 %vm1801_vm2, %v1374_v60  ;;  %v772_v58 = vmul.f32 %v1470_v62, %v1752_v1  ;;  %v81_v1 = vld [vmem:[#allocation7 + $0x8] sm:$0xff] }
 0x2dc   :  { %1481 = vrcp.f32 %v734_v0  ;;  %1379 = vmatpush3.bf16.xpose.msk.msra.mxu0 %vm1801_vm2, %v1374_v60 }
 0x2dd   :  { %v1472_v2 = vpop.eup %1471  ;;  %v1386_v54 = vpack.c.bf16 %v773_v61, %v772_v58 }
 0x2de   :  { %v1474_v3 = vpop.eup %1473  ;;  %v749_v8 = vpop.xlane.xlu1 %748  ;;  %v775_v10 = vmul.f32 %v1472_v2, %v1765_v7 }
 0x2df   :  { %v746_v9 = vpop.xlane.xlu0 %745  ;;  %1483 = vrcp.f32 %v749_v8  ;;  %1388 = vmatprep.subr.msk.bf16.mxu1 %vm1801_vm2, %v1386_v54  ;;  %v774_v6 = vmul.f32 %v1474_v3, %v1762_v13  ;;  %v83_v13 = vld [vmem:[#allocation7 + $0x18] sm:$0xff] }
 0x2e0   :  { %1485 = vrcp.f32 %v746_v9  ;;  %1391 = vmatpush3.bf16.xpose.msk.msra.mxu1 %vm1801_vm2, %v1386_v54 }
 0x2e1   :  { %v1476_v11 = vpop.eup %1475  ;;  %v1392_v12 = vpack.c.bf16 %v775_v10, %v774_v6 }
 0x2e2   :  { %v1478_v14 = vpop.eup %1477  ;;  %v779_v15 = vmul.f32 %v1476_v11, %v1773_v18 }
 0x2e3   :  { %1394 = vmatprep.subr.msk.bf16.mxu0 %vm1801_vm2, %v1392_v12  ;;  %1317 = vmatmul.mubr.msk.f32.vlgmr.msra.gmra.mrb[8].mxu0 %vm605_vm1, %v81_v1  ;;  %v778_v7 = vmul.f32 %v1478_v14, %v1771_v17 }
 0x2e4   :  { %1397 = vmatpush3.bf16.xpose.msk.msra.mxu0 %vm1801_vm2, %v1392_v12  ;;  %1338 = vmatprep.mubr.msk.f32.mxu0 %vm605_vm1, %v84_v4 }
 0x2e5   :  { %v1480_v16 = vpop.eup %1479  ;;  %v1404_v5 = vpack.c.bf16 %v779_v15, %v778_v7 }
 0x2e6   :  { %v1482_v22 = vpop.eup %1481  ;;  %v777_v23 = vmul.f32 %v1480_v16, %v1781_v21 }
 0x2e7   :  { %1328 = vmatmul.mubr.msk.f32.vlgmr.msra.gmra.mrb[8].mxu1 %vm605_vm1, %v83_v13  ;;  %1406 = vmatprep.subr.msk.bf16.mxu1 %vm1801_vm2, %v1404_v5  ;;  %v776_v18 = vmul.f32 %v1482_v22, %v1779_v20  ;;  %v85_v20 = vld [vmem:[#allocation7 + $0x28] sm:$0xff] }
 0x2e8   :  { %1409 = vmatpush3.bf16.xpose.msk.msra.mxu1 %vm1801_vm2, %v1404_v5  ;;  %1349 = vmatprep.mubr.msk.f32.mxu1 %vm605_vm1, %v86_v19 }
 0x2e9   :  { %v1484_v17 = vpop.eup %1483  ;;  %v1398_v26 = vpack.c.bf16 %v777_v23, %v776_v18 }
 0x2ea   :  { %v1486_v27 = vpop.eup %1485  ;;  %v781_v28 = vmul.f32 %v1484_v17, %v1789_v25 }
 0x2eb   :  { %1400 = vmatprep.subr.msk.bf16.mxu0 %vm1801_vm2, %v1398_v26  ;;  %v780_v21 = vmul.f32 %v1486_v27, %v1787_v24 }
 0x2ec   :  { %1403 = vmatpush3.bf16.xpose.msk.msra.mxu0 %vm1801_vm2, %v1398_v26 }
 0x2ed   :  { %v1410_v29 = vpack.c.bf16 %v781_v28, %v780_v21 }
 0x2ef   :  { %1412 = vmatprep.subr.msk.bf16.mxu1 %vm1801_vm2, %v1410_v29 }
 0x2f0   :  { %1415 = vmatpush3.bf16.xpose.msk.msra.mxu1 %vm1801_vm2, %v1410_v29 }
 0x2f3   :  { %1339 = vmatmul.mubr.msk.f32.vlgmr.msra.gmra.mrb[10].mxu0 %vm605_vm1, %v85_v20 }
 0x2f7   :  { %1350 = vmatmul.mubr.msk.f32.vlgmr.msra.gmra.mrb[10].mxu1 %vm605_vm1, %v87_v30 }
 0x3b6   :  { %v1318_v25 = vpop.f32.mrb[8].mxu0 }
 0x3b7   :  { %1155 = vst.msk [vmem:[#allocation8 + $0x8] sm:$0xff] %vm605_vm1, %v1318_v25  ;;  %v866_v24 = vpop.f32.mrb[9].mxu0 }
 0x3b8   :  { %1154 = vst.msk [vmem:[#allocation8] sm:$0xff] %vm605_vm1, %v866_v24 }
 0x3ba   :  { %v1329_v32 = vpop.f32.mrb[8].mxu1 }
 0x3bb   :  { %1157 = vst.msk [vmem:[#allocation8 + $0x18] sm:$0xff] %vm605_vm1, %v1329_v32  ;;  %v959_v34 = vpop.f32.mrb[9].mxu1 }
 0x3bc   :  { %1156 = vst.msk [vmem:[#allocation8 + $0x10] sm:$0xff] %vm605_vm1, %v959_v34 }
 0x3c6   :  { %v1340_v35 = vpop.f32.mrb[10].mxu0 }
 0x3c7   :  { %1159 = vst.msk [vmem:[#allocation8 + $0x28] sm:$0xff] %vm605_vm1, %v1340_v35  ;;  %v1052_v36 = vpop.f32.mrb[11].mxu0 }
 0x3c8   :  { %1158 = vst.msk [vmem:[#allocation8 + $0x20] sm:$0xff] %vm605_vm1, %v1052_v36 }
 0x3ca   :  { %v1351_v37 = vpop.f32.mrb[10].mxu1 }
 0x3cb   :  { %1161 = vst.msk [vmem:[#allocation8 + $0x38] sm:$0xff] %vm605_vm1, %v1351_v37  ;;  %v1145_v38 = vpop.f32.mrb[11].mxu1 }
 0x3cc   :  { %1160 = vst.msk [vmem:[#allocation8 + $0x30] sm:$0xff] %vm605_vm1, %v1145_v38 }
 0x3cd   :  { %1564 = shalt.err (!%p1561_p0)
}
 0x3ce   :  { %s1565_s27 = scalar_lea.hbm %s1883_s3, 1024 }
 0x3cf   :  { %p1566_p1 = scmp.ne.s32.totalorder %s1883_s3, %s1565_s27  ;;  %p1569_p2 = scmp.lt.u32.totalorder %s1565_s27, %s1883_s3 }
 0x3d1   :  { %p1571_p3 = pnand %p1569_p2, %p1566_p1 }
 0x3d3   :  { %1574 = shalt.err (!%p1571_p3)
}
 0x3d4   :  { %1173 = dma.vmem_to_hbm [thread:$0]  %s1168_s21, 1024, %s1883_s3, [#allocation4], %s1583_s24, %s1583_s24, %s1584_s25  }
 0x3d5   :  { %1579 = dma.done.wait [#allocation4], 1024  }
 0x3d6   :  { %1580 = vsyncadd [#allocation4], 4294966272 }
 0x3d7   :  { %1177 = vsyncpa [#allocation3], 1 }
 0x3d8   :  { %1178 = vsyncpa [#allocation6], 1 }
 0x3d9   :  { %1179 = vsyncpa [#allocation4], 1 }

</bundles_post_ra>
